<compile_context>
chip_gen: v7x
topology: tpu7x:2x2x1
jax: 0.10.0
libtpu: 0.0.40
codegen_flags: <defaults>
</compile_context>

<pallas_src>
import jax
import jax.numpy as jnp
from jax import lax
from jax.experimental import pallas as pl
from jax.experimental.pallas import tpu as pltpu

_NEG = -1e30  # "minus infinity" that stays NaN-free through exp/max


def _round_up(x, m):
    return (x + m - 1) // m * m


# ----------------------------------------------------------------------------
# Pallas kernel: one (token block, tile slot) grid step
# ----------------------------------------------------------------------------
def splitce_kernel(block_tiles_ref, num_needed_ref, tile_group_ref, tile_col0_ref,  # SMEM prefetch
                   h_ref, w_ref, b_ref,                                             # streamed VMEM blocks
                   tgt_group_ref, head_pick_ref, tail_pick_ref,                     # per-token metadata
                   loss_ref,                                                        # out: (TN, 1) f32
                   m_head, l_head, p_head, m_tail, l_tail, p_tail):                 # scratch accumulators
    i = pl.program_id(0)
    j = pl.program_id(1)
    n_slots = pl.num_programs(1)

    # ---- init accumulators at the first slot of this token block ------------
    @pl.when(j == 0)
    def _init():
        m_head[...] = jnp.full_like(m_head, _NEG)
        l_head[...] = jnp.zeros_like(l_head)
        p_head[...] = jnp.zeros_like(p_head)
        m_tail[...] = jnp.full_like(m_tail, _NEG)
        # 1.0 (not 0.0) so log(l_tail) stays finite for head-only tokens; the seed
        # is annihilated by exp(-1e30 - m) == 0 on the first real tail update.
        l_tail[...] = jnp.ones_like(l_tail)
        p_tail[...] = jnp.zeros_like(p_tail)

    t = block_tiles_ref[i * n_slots + j]    # actual vocab tile processed in this slot
    g = tile_group_ref[t]                   # softmax group of that tile (0 = head)
    col0 = tile_col0_ref[t]                 # column offset of the tile inside its group
    valid = j < num_needed_ref[i]           # padding slots repeat the previous tile: skip

    @pl.when(valid)
    def _compute():
        # (TN, H) bf16 x (TV, H) bf16 -> (TN, TV) f32 on the MXU (trans-B is free)
        logits = lax.dot_general(
            h_ref[...], w_ref[...],
            dimension_numbers=(((1,), (1,)), ((), ())),
            preferred_element_type=jnp.float32) + b_ref[...]

        lane = lax.broadcasted_iota(jnp.int32, logits.shape, 1)   # static, constant-folds
        row_max = jnp.max(logits, axis=-1, keepdims=True)

        # ---- head group: every token needs the head logsumexp ---------------
        @pl.when(g == 0)
        def _head():
            m_old = m_head[...]
            m_new = jnp.maximum(m_old, row_max)
            l_head[...] = (l_head[...] * jnp.exp(m_old - m_new)
                           + jnp.sum(jnp.exp(logits - m_new), axis=-1, keepdims=True))
            m_head[...] = m_new
            # gather: target column for head tokens, cluster column for tail tokens
            p_head[...] = p_head[...] + jnp.sum(
                jnp.where(lane == (head_pick_ref[...] - col0), logits, 0.0),
                axis=-1, keepdims=True)

        # ---- tail group g: only tokens whose target lives in group g update --
        @pl.when(g > 0)
        def _tail():
            mine = tgt_group_ref[...] == g
            m_old = m_tail[...]
            m_cand = jnp.maximum(m_old, row_max)
            l_cand = (l_tail[...] * jnp.exp(m_old - m_cand)
                      + jnp.sum(jnp.exp(logits - m_cand), axis=-1, keepdims=True))
            m_tail[...] = jnp.where(mine, m_cand, m_old)
            l_tail[...] = jnp.where(mine, l_cand, l_tail[...])
            picked = jnp.sum(jnp.where(lane == (tail_pick_ref[...] - col0), logits, 0.0),
                             axis=-1, keepdims=True)
            p_tail[...] = p_tail[...] + jnp.where(mine, picked, 0.0)

    # ---- finalize after the last slot (uses only the scratch accumulators) ---
    @pl.when(j == n_slots - 1)
    def _fin():
        loss = (m_head[...] + jnp.log(l_head[...])) - p_head[...]
        tail_lse = m_tail[...] + jnp.log(l_tail[...])
        loss = loss + jnp.where(tgt_group_ref[...] > 0, tail_lse - p_tail[...], 0.0)
        loss_ref[...] = loss


# ----------------------------------------------------------------------------
# One-time weight packing (hoisted out of the per-step loss call)
# ----------------------------------------------------------------------------
def pack_split_softmax_weights(weight, bias, tail_vectors, tail_bias, splits, *, tv=512):
    """Column-block the classifier into softmax groups padded to multiples of tv.

    Call ONCE (model init / after each optimizer step): this reads the full (V, H)
    f32 weight and writes the bf16 streaming copy.  Returns
    (w_all bf16 (Vpad, H), b_all f32 (1, Vpad), tile_group i32, tile_col0 i32).
    The bias stays f32 so the -1e30 column padding never turns into bf16 -inf.
    """
    vocab, hidden = weight.shape
    s1 = splits[1]
    nsplits = len(splits) - 1
    assert tv % 128 == 0, "vocab tile must be 128-lane aligned"

    w_parts, b_parts, tile_group, tile_col0 = [], [], [], []

    def add_group(gw, gb, gid):
        c = gw.shape[0]
        cp = max(_round_up(max(c, 1), tv), tv)
        wp = jnp.zeros((cp, hidden), jnp.bfloat16).at[:c].set(gw.astype(jnp.bfloat16))
        bp = jnp.full((cp,), _NEG, jnp.float32).at[:c].set(gb.astype(jnp.float32))
        w_parts.append(wp)
        b_parts.append(bp)
        for tix in range(cp // tv):
            tile_group.append(gid)
            tile_col0.append(tix * tv)

    head_w = jnp.concatenate([weight[:s1], tail_vectors], axis=0)
    head_b = jnp.concatenate([bias[:s1], tail_bias], axis=0)
    add_group(head_w, head_b, 0)
    for c in range(1, nsplits):
        start, end = splits[c], min(splits[c + 1], vocab)
        add_group(weight[start:end], bias[start:end], c)

    w_all = jnp.concatenate(w_parts, axis=0)                   # (n_tiles*tv, H) bf16
    b_all = jnp.concatenate(b_parts, axis=0).reshape(1, -1)    # (1, n_tiles*tv) f32
    return (w_all, b_all,
            jnp.asarray(tile_group, jnp.int32), jnp.asarray(tile_col0, jnp.int32))


# ----------------------------------------------------------------------------
# Per-step loss on pre-packed weights
# ----------------------------------------------------------------------------
def split_cross_entropy_loss(packed, hiddens, targets, splits, *, tn=256):
    """Forward pass of SplitCrossEntropyLoss.

    tn (token tile) roofline guidance: >=256 on v5e, 256..768 (multiple of 256) on
    v6e, 384..512 on v7x (64 MiB VMEM; keep n_blocks >= 2 so both TCs have work).
    """
    w_all, b_all, tile_group_arr, tile_col0_arr = packed
    hidden = w_all.shape[1]
    total_cols = w_all.shape[0]
    n_tiles = int(tile_group_arr.shape[0])
    tv = total_cols // n_tiles
    s1 = splits[1]
    nsplits = len(splits) - 1

    if hiddens.ndim > 2:
        hiddens = hiddens.reshape(-1, hiddens.shape[-1])
    n = hiddens.shape[0]

    tn_eff = _round_up(min(tn, _round_up(n, 16)), 16)   # bf16 sublane packing = 16
    n_pad = _round_up(n, tn_eff)
    n_blocks = n_pad // tn_eff

    h_pad = jnp.zeros((n_pad, hidden), jnp.bfloat16).at[:n].set(
        hiddens.astype(jnp.bfloat16))
    t_pad = jnp.zeros((n_pad,), jnp.int32).at[:n].set(targets.astype(jnp.int32))

    # ---- per-token routing metadata ------------------------------------------
    tgt_group = jnp.zeros((n_pad,), jnp.int32)
    for c in range(1, nsplits):
        tgt_group = tgt_group + (t_pad >= splits[c]).astype(jnp.int32)
    cluster_start = jnp.zeros((n_pad,), jnp.int32)
    for c in range(1, nsplits):
        cluster_start = jnp.where(tgt_group == c, splits[c], cluster_start)
    head_pick = jnp.where(tgt_group == 0, t_pad, s1 + tgt_group - 1)
    tail_pick = t_pad - cluster_start

    # ---- per-(token block) compacted tile schedule (split_on_targets analogue) ----
    # Needed tiles first (head always; a tail group only if some token of the block
    # targets it).  Padding slots repeat the last needed tile so their DMA is elided
    # (unchanged block index) and their compute is gated off in-kernel.
    grp_of_block = tgt_group.reshape(n_blocks, tn_eff)
    present = (grp_of_block[:, :, None] == jnp.arange(nsplits)[None, None, :]).any(axis=1)
    present = present.at[:, 0].set(True)                           # head needed by all
    tile_needed = present[:, tile_group_arr]                       # (n_blocks, n_tiles)
    key = jnp.where(tile_needed, 0, n_tiles) + jnp.arange(n_tiles)[None, :]
    order = jnp.argsort(key, axis=1).astype(jnp.int32)             # needed first, ascending
    num_needed = jnp.sum(tile_needed, axis=1).astype(jnp.int32)    # (n_blocks,)
    last_needed = jnp.take_along_axis(order, (num_needed - 1)[:, None], axis=1)
    slot = jnp.arange(n_tiles)[None, :]
    block_tiles = jnp.where(slot < num_needed[:, None], order, last_needed)
    block_tiles = block_tiles.reshape(-1).astype(jnp.int32)        # 1D -> compact SMEM

    tgt_group = tgt_group.reshape(n_pad, 1)
    head_pick = head_pick.reshape(n_pad, 1)
    tail_pick = tail_pick.reshape(n_pad, 1)

    grid_spec = pltpu.PrefetchScalarGridSpec(
        num_scalar_prefetch=4,
        grid=(n_blocks, n_tiles),
        in_specs=[
            pl.BlockSpec((tn_eff, hidden), lambda i, j, bt, nn, tg, tc: (i, 0)),
            # data-dependent weight/bias tile (P2): unneeded tiles are never fetched
            pl.BlockSpec((tv, hidden),
                         lambda i, j, bt, nn, tg, tc: (bt[i * n_tiles + j], 0)),
            pl.BlockSpec((1, tv),
                         lambda i, j, bt, nn, tg, tc: (0, bt[i * n_tiles + j])),
            pl.BlockSpec((tn_eff, 1), lambda i, j, bt, nn, tg, tc: (i, 0)),
            pl.BlockSpec((tn_eff, 1), lambda i, j, bt, nn, tg, tc: (i, 0)),
            pl.BlockSpec((tn_eff, 1), lambda i, j, bt, nn, tg, tc: (i, 0)),
        ],
        # TODO(synk): lane-dense (1, tn_eff) output blocks would avoid masked stores,
        # but need a (TN,1)->(1,TN) in-kernel transpose; written once per block so low value.
        out_specs=pl.BlockSpec((tn_eff, 1), lambda i, j, bt, nn, tg, tc: (i, 0)),
        scratch_shapes=[pltpu.VMEM((tn_eff, 1), jnp.float32)] * 6,
    )

    cost = pl.CostEstimate(
        flops=2 * n_pad * total_cols * hidden,
        transcendentals=n_pad * total_cols,
        bytes_accessed=(n_blocks * total_cols * (hidden * 2 + 4)   # weight + bias streams
                        + n_pad * hidden * 2 + n_pad * 4))

    per_token = pl.pallas_call(
        splitce_kernel,
        out_shape=jax.ShapeDtypeStruct((n_pad, 1), jnp.float32),
        grid_spec=grid_spec,
        compiler_params=pltpu.CompilerParams(
            dimension_semantics=("parallel", "arbitrary")),
        cost_estimate=cost,
    )(block_tiles, num_needed, tile_group_arr, tile_col0_arr,
      h_pad, w_all, b_all, tgt_group, head_pick, tail_pick)

    # tiny finalization in plain JAX (handles the partial last token block correctly;
    # padded tokens' losses are discarded here, never folded into the kernel sum)
    return jnp.sum(per_token[:n, 0]) / n


# ----------------------------------------------------------------------------
# Pure-JAX f32 reference (mirrors the PyTorch forward semantics)
# ----------------------------------------------------------------------------
def reference_loss(weight, bias, tail_vectors, tail_bias, hiddens, targets, splits):
    vocab = weight.shape[0]
    s1 = splits[1]
    nsplits = len(splits) - 1
    if hiddens.ndim > 2:
        hiddens = hiddens.reshape(-1, hiddens.shape[-1])
    n = targets.shape[0]

    head_w = jnp.concatenate([weight[:s1], tail_vectors], axis=0)
    head_b = jnp.concatenate([bias[:s1], tail_bias], axis=0)
    head_lsm = jax.nn.log_softmax(hiddens @ head_w.T + head_b, axis=-1)

    safe_t = jnp.clip(targets, 0, head_lsm.shape[1] - 1)
    head_lp = jnp.take_along_axis(head_lsm, safe_t[:, None], axis=1)[:, 0]
    loss = jnp.where(targets < s1, -head_lp, 0.0)

    for c in range(1, nsplits):
        start, end = splits[c], min(splits[c + 1], vocab)
        tail_lsm = jax.nn.log_softmax(hiddens @ weight[start:end].T + bias[start:end], -1)
        idx = jnp.clip(targets - start, 0, tail_lsm.shape[1] - 1)
        tail_lp = jnp.take_along_axis(tail_lsm, idx[:, None], axis=1)[:, 0]
        in_c = (targets >= start) & (targets < splits[c + 1])
        loss = loss + jnp.where(in_c, -(head_lsm[:, s1 + c - 1] + tail_lp), 0.0)

    return jnp.sum(loss) / n


# ----------------------------------------------------------------------------
if __name__ == "__main__":
    # Small but structure-exercising shapes: hidden=32, vocab=384,
    # splits at [130, 260] -> 3 clusters (unaligned boundaries -> padding path),
    # 32 tokens in 2 token blocks of 16, vocab tile 128 (5 weight tiles).
    # First block is head-only so the tail-tile skipping path is exercised.
    hidden_size = 32
    vocab = 384
    user_splits = [130, 260]
    splits = [0] + user_splits + [100 * 1000000]
    nsplits = len(splits) - 1
    n_tokens = 32

    key = jax.random.PRNGKey(0)
    k_w, k_b, k_h, k_t1, k_t2 = jax.random.split(key, 5)

    weight = jax.random.normal(k_w, (vocab, hidden_size), jnp.float32) * 0.1
    bias = jax.random.normal(k_b, (vocab,), jnp.float32) * 0.1
    hiddens = jax.random.normal(k_h, (n_tokens, hidden_size), jnp.float32)
    targets = jnp.concatenate([
        jax.random.randint(k_t1, (16,), 0, user_splits[0], jnp.int32),   # head-only block
        jax.random.randint(k_t2, (16,), 0, vocab, jnp.int32),            # mixed block
    ])

    # module parameters per __init__: zero-initialized (tied_weights=False)
    tail_vectors = jnp.zeros((nsplits - 1, hidden_size), jnp.float32)
    tail_bias = jnp.zeros((nsplits - 1,), jnp.float32)

    # pack once (hoisted out of the per-step loss call), then evaluate the loss
    packed = pack_split_softmax_weights(weight, bias, tail_vectors, tail_bias,
                                        splits, tv=128)
    out = split_cross_entropy_loss(packed, hiddens, targets, splits, tn=16)
    out = jax.block_until_ready(out)

    ref = reference_loss(weight, bias, tail_vectors, tail_bias,
                         hiddens, targets, splits)
    ref = jax.block_until_ready(ref)

    # bf16 matmul operands -> small drift vs the f32 reference
    assert jnp.allclose(out, ref, rtol=2e-2, atol=2e-2), (out, ref)
    print("KERNEL_OK")
</pallas_src>

<mosaic_0001>
module attributes {stable_mosaic.version = 11 : i64} {
  func.func @splitce_kernel(%arg0: i32, %arg1: i32, %arg2: memref<10xi32, #tpu.memory_space<smem>>, %arg3: memref<2xi32, #tpu.memory_space<smem>>, %arg4: memref<5xi32, #tpu.memory_space<smem>>, %arg5: memref<5xi32, #tpu.memory_space<smem>>, %arg6: memref<16x32xbf16, #tpu.memory_space<vmem>>, %arg7: memref<128x32xbf16, #tpu.memory_space<vmem>>, %arg8: memref<1x128xf32, #tpu.memory_space<vmem>>, %arg9: memref<16x1xi32, #tpu.memory_space<vmem>>, %arg10: memref<16x1xi32, #tpu.memory_space<vmem>>, %arg11: memref<16x1xi32, #tpu.memory_space<vmem>>, %arg12: memref<16x1xf32, #tpu.memory_space<vmem>>, %arg13: memref<16x1xf32, #tpu.memory_space<vmem>>, %arg14: memref<16x1xf32, #tpu.memory_space<vmem>>, %arg15: memref<16x1xf32, #tpu.memory_space<vmem>>, %arg16: memref<16x1xf32, #tpu.memory_space<vmem>>, %arg17: memref<16x1xf32, #tpu.memory_space<vmem>>, %arg18: memref<16x1xf32, #tpu.memory_space<vmem>>) attributes {dimension_semantics = [#tpu.dimension_semantics<parallel>, #tpu.dimension_semantics<arbitrary>], iteration_bounds = array<i64: 2, 5>, scalar_prefetch = 4 : i64, scratch_operands = 6 : i64, tpu.core_type = #tpu.core_type<tc>, window_params = [{transform_indices = @transform_0, window_bounds = array<i64: 16, 32>}, {transform_indices = @transform_1, window_bounds = array<i64: 128, 32>}, {transform_indices = @transform_2, window_bounds = array<i64: 1, 128>}, {transform_indices = @transform_3, window_bounds = array<i64: 16, 1>}, {transform_indices = @transform_4, window_bounds = array<i64: 16, 1>}, {transform_indices = @transform_5, window_bounds = array<i64: 16, 1>}, {transform_indices = @transform_6, window_bounds = array<i64: 16, 1>}]} {
    %c0_i32 = arith.constant 0 : i32
    %0 = arith.cmpi eq, %arg1, %c0_i32 : i32
    %1 = arith.extui %0 : i1 to i32
    %c0_i32_0 = arith.constant 0 : i32
    %2 = arith.cmpi ne, %1, %c0_i32_0 : i32
    scf.if %2 {
      %cst = arith.constant -1.000000e+30 : f32
      %19 = vector.broadcast %cst : f32 to vector<16x1xf32>
      %c0 = arith.constant 0 : index
      %c0_3 = arith.constant 0 : index
      %20 = vector.load %arg13[%c0, %c0_3] : memref<16x1xf32, #tpu.memory_space<vmem>>, vector<16x1xf32>
      tpu.vector_store %arg13[%c0, %c0_3], %19 {strides = array<i32>} : memref<16x1xf32, #tpu.memory_space<vmem>>, vector<16x1xf32>,
      %cst_4 = arith.constant 0.000000e+00 : f32
      %21 = vector.broadcast %cst_4 : f32 to vector<16x1xf32>
      %c0_5 = arith.constant 0 : index
      %c0_6 = arith.constant 0 : index
      %22 = vector.load %arg14[%c0_5, %c0_6] : memref<16x1xf32, #tpu.memory_space<vmem>>, vector<16x1xf32>
      tpu.vector_store %arg14[%c0_5, %c0_6], %21 {strides = array<i32>} : memref<16x1xf32, #tpu.memory_space<vmem>>, vector<16x1xf32>,
      %cst_7 = arith.constant 0.000000e+00 : f32
      %23 = vector.broadcast %cst_7 : f32 to vector<16x1xf32>
      %c0_8 = arith.constant 0 : index
      %c0_9 = arith.constant 0 : index
      %24 = vector.load %arg15[%c0_8, %c0_9] : memref<16x1xf32, #tpu.memory_space<vmem>>, vector<16x1xf32>
      tpu.vector_store %arg15[%c0_8, %c0_9], %23 {strides = array<i32>} : memref<16x1xf32, #tpu.memory_space<vmem>>, vector<16x1xf32>,
      %cst_10 = arith.constant -1.000000e+30 : f32
      %25 = vector.broadcast %cst_10 : f32 to vector<16x1xf32>
      %c0_11 = arith.constant 0 : index
      %c0_12 = arith.constant 0 : index
      %26 = vector.load %arg16[%c0_11, %c0_12] : memref<16x1xf32, #tpu.memory_space<vmem>>, vector<16x1xf32>
      tpu.vector_store %arg16[%c0_11, %c0_12], %25 {strides = array<i32>} : memref<16x1xf32, #tpu.memory_space<vmem>>, vector<16x1xf32>,
      %cst_13 = arith.constant 1.000000e+00 : f32
      %27 = vector.broadcast %cst_13 : f32 to vector<16x1xf32>
      %c0_14 = arith.constant 0 : index
      %c0_15 = arith.constant 0 : index
      %28 = vector.load %arg17[%c0_14, %c0_15] : memref<16x1xf32, #tpu.memory_space<vmem>>, vector<16x1xf32>
      tpu.vector_store %arg17[%c0_14, %c0_15], %27 {strides = array<i32>} : memref<16x1xf32, #tpu.memory_space<vmem>>, vector<16x1xf32>,
      %cst_16 = arith.constant 0.000000e+00 : f32
      %29 = vector.broadcast %cst_16 : f32 to vector<16x1xf32>
      %c0_17 = arith.constant 0 : index
      %c0_18 = arith.constant 0 : index
      %30 = vector.load %arg18[%c0_17, %c0_18] : memref<16x1xf32, #tpu.memory_space<vmem>>, vector<16x1xf32>
      tpu.vector_store %arg18[%c0_17, %c0_18], %29 {strides = array<i32>} : memref<16x1xf32, #tpu.memory_space<vmem>>, vector<16x1xf32>,
    } else {
    }
    %c5_i32 = arith.constant 5 : i32
    %3 = arith.muli %arg0, %c5_i32 : i32
    %4 = arith.addi %3, %arg1 : i32
    %5 = arith.index_cast %4 : i32 to index
    %6 = memref.load %arg2[%5] : memref<10xi32, #tpu.memory_space<smem>>
    %7 = arith.index_cast %6 : i32 to index
    %8 = memref.load %arg4[%7] : memref<5xi32, #tpu.memory_space<smem>>
    %9 = arith.index_cast %6 : i32 to index
    %10 = memref.load %arg5[%9] : memref<5xi32, #tpu.memory_space<smem>>
    %11 = arith.index_cast %arg0 : i32 to index
    %12 = memref.load %arg3[%11] : memref<2xi32, #tpu.memory_space<smem>>
    %13 = arith.cmpi slt, %arg1, %12 : i32
    %14 = arith.extui %13 : i1 to i32
    %c0_i32_1 = arith.constant 0 : i32
    %15 = arith.cmpi ne, %14, %c0_i32_1 : i32
    scf.if %15 {
      %c0 = arith.constant 0 : index
      %c0_3 = arith.constant 0 : index
      %19 = vector.load %arg6[%c0, %c0_3] : memref<16x32xbf16, #tpu.memory_space<vmem>>, vector<16x32xbf16>
      %c0_4 = arith.constant 0 : index
      %c0_5 = arith.constant 0 : index
      %20 = vector.load %arg7[%c0_4, %c0_5] : memref<128x32xbf16, #tpu.memory_space<vmem>>, vector<128x32xbf16>
      %cst = arith.constant dense<0.000000e+00> : vector<16x128xf32>
      %21 = tpu.matmul %19, %20, %cst {dimension_numbers = #tpu.dot_dimension_numbers<[1], [1], [0], [0], [0, 0, 1, 0], [], []>} : vector<16x32xbf16>, vector<128x32xbf16>, vector<16x128xf32> -> vector<16x128xf32>
      %c0_6 = arith.constant 0 : index
      %c0_7 = arith.constant 0 : index
      %22 = vector.load %arg8[%c0_6, %c0_7] : memref<1x128xf32, #tpu.memory_space<vmem>>, vector<1x128xf32>
      %23 = vector.broadcast %22 : vector<1x128xf32> to vector<16x128xf32>
      %24 = arith.addf %21, %23 : vector<16x128xf32>
      %25 = tpu.iota {dimensions = array<i32: 1>} : vector<16x128xi32>
      %cst_8 = arith.constant dense<0xFF800000> : vector<16xf32>
      %26 = vector.multi_reduction <maximumf>, %24, %cst_8 [1] : vector<16x128xf32> to vector<16xf32>
      %27 = vector.shape_cast %26 : vector<16xf32> to vector<16x1xf32>
      %c0_i32_9 = arith.constant 0 : i32
      %28 = arith.cmpi eq, %8, %c0_i32_9 : i32
      %29 = arith.extui %28 : i1 to i32
      %c0_i32_10 = arith.constant 0 : i32
      %30 = arith.cmpi ne, %29, %c0_i32_10 : i32
      scf.if %30 {
        %c0_13 = arith.constant 0 : index
        %c0_14 = arith.constant 0 : index
        %34 = vector.load %arg13[%c0_13, %c0_14] : memref<16x1xf32, #tpu.memory_space<vmem>>, vector<16x1xf32>
        %35 = arith.maximumf %34, %27 : vector<16x1xf32>
        %c0_15 = arith.constant 0 : index
        %c0_16 = arith.constant 0 : index
        %36 = vector.load %arg14[%c0_15, %c0_16] : memref<16x1xf32, #tpu.memory_space<vmem>>, vector<16x1xf32>
        %37 = arith.subf %34, %35 : vector<16x1xf32>
        %38 = math.exp %37 : vector<16x1xf32>
        %39 = arith.mulf %36, %38 : vector<16x1xf32>
        %40 = vector.broadcast %35 : vector<16x1xf32> to vector<16x128xf32>
        %41 = arith.subf %24, %40 : vector<16x128xf32>
        %42 = math.exp %41 : vector<16x128xf32>
        %cst_17 = arith.constant dense<0.000000e+00> : vector<16xf32>
        %43 = vector.multi_reduction <add>, %42, %cst_17 [1] : vector<16x128xf32> to vector<16xf32>
        %44 = vector.shape_cast %43 : vector<16xf32> to vector<16x1xf32>
        %45 = arith.addf %39, %44 : vector<16x1xf32>
        %c0_18 = arith.constant 0 : index
        %c0_19 = arith.constant 0 : index
        %46 = vector.load %arg14[%c0_18, %c0_19] : memref<16x1xf32, #tpu.memory_space<vmem>>, vector<16x1xf32>
        tpu.vector_store %arg14[%c0_18, %c0_19], %45 {strides = array<i32>} : memref<16x1xf32, #tpu.memory_space<vmem>>, vector<16x1xf32>,
        %c0_20 = arith.constant 0 : index
        %c0_21 = arith.constant 0 : index
        %47 = vector.load %arg13[%c0_20, %c0_21] : memref<16x1xf32, #tpu.memory_space<vmem>>, vector<16x1xf32>
        tpu.vector_store %arg13[%c0_20, %c0_21], %35 {strides = array<i32>} : memref<16x1xf32, #tpu.memory_space<vmem>>, vector<16x1xf32>,
        %c0_22 = arith.constant 0 : index
        %c0_23 = arith.constant 0 : index
        %48 = vector.load %arg15[%c0_22, %c0_23] : memref<16x1xf32, #tpu.memory_space<vmem>>, vector<16x1xf32>
        %c0_24 = arith.constant 0 : index
        %c0_25 = arith.constant 0 : index
        %49 = vector.load %arg10[%c0_24, %c0_25] : memref<16x1xi32, #tpu.memory_space<vmem>>, vector<16x1xi32>
        %50 = vector.broadcast %10 : i32 to vector<16x1xi32>
        %51 = arith.subi %49, %50 : vector<16x1xi32>
        %52 = vector.broadcast %51 : vector<16x1xi32> to vector<16x128xi32>
        %53 = arith.cmpi eq, %25, %52 : vector<16x128xi32>
        %cst_26 = arith.constant 0.000000e+00 : f32
        %54 = vector.broadcast %cst_26 : f32 to vector<16x128xf32>
        %55 = arith.select %53, %24, %54 : vector<16x128xi1>, vector<16x128xf32>
        %cst_27 = arith.constant dense<0.000000e+00> : vector<16xf32>
        %56 = vector.multi_reduction <add>, %55, %cst_27 [1] : vector<16x128xf32> to vector<16xf32>
        %57 = vector.shape_cast %56 : vector<16xf32> to vector<16x1xf32>
        %58 = arith.addf %48, %57 : vector<16x1xf32>
        %c0_28 = arith.constant 0 : index
        %c0_29 = arith.constant 0 : index
        %59 = vector.load %arg15[%c0_28, %c0_29] : memref<16x1xf32, #tpu.memory_space<vmem>>, vector<16x1xf32>
        tpu.vector_store %arg15[%c0_28, %c0_29], %58 {strides = array<i32>} : memref<16x1xf32, #tpu.memory_space<vmem>>, vector<16x1xf32>,
      } else {
      }
      %c0_i32_11 = arith.constant 0 : i32
      %31 = arith.cmpi sgt, %8, %c0_i32_11 : i32
      %32 = arith.extui %31 : i1 to i32
      %c0_i32_12 = arith.constant 0 : i32
      %33 = arith.cmpi ne, %32, %c0_i32_12 : i32
      scf.if %33 {
        %c0_13 = arith.constant 0 : index
        %c0_14 = arith.constant 0 : index
        %34 = vector.load %arg9[%c0_13, %c0_14] : memref<16x1xi32, #tpu.memory_space<vmem>>, vector<16x1xi32>
        %35 = vector.broadcast %8 : i32 to vector<16x1xi32>
        %36 = arith.cmpi eq, %34, %35 : vector<16x1xi32>
        %c0_15 = arith.constant 0 : index
        %c0_16 = arith.constant 0 : index
        %37 = vector.load %arg16[%c0_15, %c0_16] : memref<16x1xf32, #tpu.memory_space<vmem>>, vector<16x1xf32>
        %38 = arith.maximumf %37, %27 : vector<16x1xf32>
        %c0_17 = arith.constant 0 : index
        %c0_18 = arith.constant 0 : index
        %39 = vector.load %arg17[%c0_17, %c0_18] : memref<16x1xf32, #tpu.memory_space<vmem>>, vector<16x1xf32>
        %40 = arith.subf %37, %38 : vector<16x1xf32>
        %41 = math.exp %40 : vector<16x1xf32>
        %42 = arith.mulf %39, %41 : vector<16x1xf32>
        %43 = vector.broadcast %38 : vector<16x1xf32> to vector<16x128xf32>
        %44 = arith.subf %24, %43 : vector<16x128xf32>
        %45 = math.exp %44 : vector<16x128xf32>
        %cst_19 = arith.constant dense<0.000000e+00> : vector<16xf32>
        %46 = vector.multi_reduction <add>, %45, %cst_19 [1] : vector<16x128xf32> to vector<16xf32>
        %47 = vector.shape_cast %46 : vector<16xf32> to vector<16x1xf32>
        %48 = arith.addf %42, %47 : vector<16x1xf32>
        %49 = arith.select %36, %38, %37 : vector<16x1xi1>, vector<16x1xf32>
        %c0_20 = arith.constant 0 : index
        %c0_21 = arith.constant 0 : index
        %50 = vector.load %arg16[%c0_20, %c0_21] : memref<16x1xf32, #tpu.memory_space<vmem>>, vector<16x1xf32>
        tpu.vector_store %arg16[%c0_20, %c0_21], %49 {strides = array<i32>} : memref<16x1xf32, #tpu.memory_space<vmem>>, vector<16x1xf32>,
        %c0_22 = arith.constant 0 : index
        %c0_23 = arith.constant 0 : index
        %51 = vector.load %arg17[%c0_22, %c0_23] : memref<16x1xf32, #tpu.memory_space<vmem>>, vector<16x1xf32>
        %52 = arith.select %36, %48, %51 : vector<16x1xi1>, vector<16x1xf32>
        %c0_24 = arith.constant 0 : index
        %c0_25 = arith.constant 0 : index
        %53 = vector.load %arg17[%c0_24, %c0_25] : memref<16x1xf32, #tpu.memory_space<vmem>>, vector<16x1xf32>
        tpu.vector_store %arg17[%c0_24, %c0_25], %52 {strides = array<i32>} : memref<16x1xf32, #tpu.memory_space<vmem>>, vector<16x1xf32>,
        %c0_26 = arith.constant 0 : index
        %c0_27 = arith.constant 0 : index
        %54 = vector.load %arg11[%c0_26, %c0_27] : memref<16x1xi32, #tpu.memory_space<vmem>>, vector<16x1xi32>
        %55 = vector.broadcast %10 : i32 to vector<16x1xi32>
        %56 = arith.subi %54, %55 : vector<16x1xi32>
        %57 = vector.broadcast %56 : vector<16x1xi32> to vector<16x128xi32>
        %58 = arith.cmpi eq, %25, %57 : vector<16x128xi32>
        %cst_28 = arith.constant 0.000000e+00 : f32
        %59 = vector.broadcast %cst_28 : f32 to vector<16x128xf32>
        %60 = arith.select %58, %24, %59 : vector<16x128xi1>, vector<16x128xf32>
        %cst_29 = arith.constant dense<0.000000e+00> : vector<16xf32>
        %61 = vector.multi_reduction <add>, %60, %cst_29 [1] : vector<16x128xf32> to vector<16xf32>
        %62 = vector.shape_cast %61 : vector<16xf32> to vector<16x1xf32>
        %c0_30 = arith.constant 0 : index
        %c0_31 = arith.constant 0 : index
        %63 = vector.load %arg18[%c0_30, %c0_31] : memref<16x1xf32, #tpu.memory_space<vmem>>, vector<16x1xf32>
        %cst_32 = arith.constant 0.000000e+00 : f32
        %64 = vector.broadcast %cst_32 : f32 to vector<16x1xf32>
        %65 = arith.select %36, %62, %64 : vector<16x1xi1>, vector<16x1xf32>
        %66 = arith.addf %63, %65 : vector<16x1xf32>
        %c0_33 = arith.constant 0 : index
        %c0_34 = arith.constant 0 : index
        %67 = vector.load %arg18[%c0_33, %c0_34] : memref<16x1xf32, #tpu.memory_space<vmem>>, vector<16x1xf32>
        tpu.vector_store %arg18[%c0_33, %c0_34], %66 {strides = array<i32>} : memref<16x1xf32, #tpu.memory_space<vmem>>, vector<16x1xf32>,
      } else {
      }
    } else {
    }
    %c4_i32 = arith.constant 4 : i32
    %16 = arith.cmpi eq, %arg1, %c4_i32 : i32
    %17 = arith.extui %16 : i1 to i32
    %c0_i32_2 = arith.constant 0 : i32
    %18 = arith.cmpi ne, %17, %c0_i32_2 : i32
    scf.if %18 {
      %c0 = arith.constant 0 : index
      %c0_3 = arith.constant 0 : index
      %19 = vector.load %arg13[%c0, %c0_3] : memref<16x1xf32, #tpu.memory_space<vmem>>, vector<16x1xf32>
      %c0_4 = arith.constant 0 : index
      %c0_5 = arith.constant 0 : index
      %20 = vector.load %arg14[%c0_4, %c0_5] : memref<16x1xf32, #tpu.memory_space<vmem>>, vector<16x1xf32>
      %21 = math.log %20 : vector<16x1xf32>
      %22 = arith.addf %19, %21 : vector<16x1xf32>
      %c0_6 = arith.constant 0 : index
      %c0_7 = arith.constant 0 : index
      %23 = vector.load %arg15[%c0_6, %c0_7] : memref<16x1xf32, #tpu.memory_space<vmem>>, vector<16x1xf32>
      %24 = arith.subf %22, %23 : vector<16x1xf32>
      %c0_8 = arith.constant 0 : index
      %c0_9 = arith.constant 0 : index
      %25 = vector.load %arg16[%c0_8, %c0_9] : memref<16x1xf32, #tpu.memory_space<vmem>>, vector<16x1xf32>
      %c0_10 = arith.constant 0 : index
      %c0_11 = arith.constant 0 : index
      %26 = vector.load %arg17[%c0_10, %c0_11] : memref<16x1xf32, #tpu.memory_space<vmem>>, vector<16x1xf32>
      %27 = math.log %26 : vector<16x1xf32>
      %28 = arith.addf %25, %27 : vector<16x1xf32>
      %c0_12 = arith.constant 0 : index
      %c0_13 = arith.constant 0 : index
      %29 = vector.load %arg9[%c0_12, %c0_13] : memref<16x1xi32, #tpu.memory_space<vmem>>, vector<16x1xi32>
      %c0_i32_14 = arith.constant 0 : i32
      %30 = vector.broadcast %c0_i32_14 : i32 to vector<16x1xi32>
      %31 = arith.cmpi sgt, %29, %30 : vector<16x1xi32>
      %c0_15 = arith.constant 0 : index
      %c0_16 = arith.constant 0 : index
      %32 = vector.load %arg18[%c0_15, %c0_16] : memref<16x1xf32, #tpu.memory_space<vmem>>, vector<16x1xf32>
      %33 = arith.subf %28, %32 : vector<16x1xf32>
      %cst = arith.constant 0.000000e+00 : f32
      %34 = vector.broadcast %cst : f32 to vector<16x1xf32>
      %35 = arith.select %31, %33, %34 : vector<16x1xi1>, vector<16x1xf32>
      %36 = arith.addf %24, %35 : vector<16x1xf32>
      %c0_17 = arith.constant 0 : index
      %c0_18 = arith.constant 0 : index
      %37 = vector.load %arg12[%c0_17, %c0_18] : memref<16x1xf32, #tpu.memory_space<vmem>>, vector<16x1xf32>
      tpu.vector_store %arg12[%c0_17, %c0_18], %36 {strides = array<i32>} : memref<16x1xf32, #tpu.memory_space<vmem>>, vector<16x1xf32>,
    } else {
    }
    return
  }
  func.func @transform_0(%arg0: i32, %arg1: i32, %arg2: memref<10xi32, #tpu.memory_space<smem>>, %arg3: memref<2xi32, #tpu.memory_space<smem>>, %arg4: memref<5xi32, #tpu.memory_space<smem>>, %arg5: memref<5xi32, #tpu.memory_space<smem>>) -> (i32, i32) {
    %c0_i32 = arith.constant 0 : i32
    %c0_i32_0 = arith.constant 0 : i32
    return %arg0, %c0_i32 : i32, i32
  }
  func.func @transform_1(%arg0: i32, %arg1: i32, %arg2: memref<10xi32, #tpu.memory_space<smem>>, %arg3: memref<2xi32, #tpu.memory_space<smem>>, %arg4: memref<5xi32, #tpu.memory_space<smem>>, %arg5: memref<5xi32, #tpu.memory_space<smem>>) -> (i32, i32) {
    %c5_i32 = arith.constant 5 : i32
    %0 = arith.muli %arg0, %c5_i32 : i32
    %1 = arith.addi %0, %arg1 : i32
    %2 = arith.index_cast %1 : i32 to index
    %3 = memref.load %arg2[%2] : memref<10xi32, #tpu.memory_space<smem>>
    %c0_i32 = arith.constant 0 : i32
    %c0_i32_0 = arith.constant 0 : i32
    return %3, %c0_i32 : i32, i32
  }
  func.func @transform_2(%arg0: i32, %arg1: i32, %arg2: memref<10xi32, #tpu.memory_space<smem>>, %arg3: memref<2xi32, #tpu.memory_space<smem>>, %arg4: memref<5xi32, #tpu.memory_space<smem>>, %arg5: memref<5xi32, #tpu.memory_space<smem>>) -> (i32, i32) {
    %c5_i32 = arith.constant 5 : i32
    %0 = arith.muli %arg0, %c5_i32 : i32
    %1 = arith.addi %0, %arg1 : i32
    %2 = arith.index_cast %1 : i32 to index
    %3 = memref.load %arg2[%2] : memref<10xi32, #tpu.memory_space<smem>>
    %c0_i32 = arith.constant 0 : i32
    %c0_i32_0 = arith.constant 0 : i32
    return %c0_i32, %3 : i32, i32
  }
  func.func @transform_3(%arg0: i32, %arg1: i32, %arg2: memref<10xi32, #tpu.memory_space<smem>>, %arg3: memref<2xi32, #tpu.memory_space<smem>>, %arg4: memref<5xi32, #tpu.memory_space<smem>>, %arg5: memref<5xi32, #tpu.memory_space<smem>>) -> (i32, i32) {
    %c0_i32 = arith.constant 0 : i32
    %c0_i32_0 = arith.constant 0 : i32
    return %arg0, %c0_i32 : i32, i32
  }
  func.func @transform_4(%arg0: i32, %arg1: i32, %arg2: memref<10xi32, #tpu.memory_space<smem>>, %arg3: memref<2xi32, #tpu.memory_space<smem>>, %arg4: memref<5xi32, #tpu.memory_space<smem>>, %arg5: memref<5xi32, #tpu.memory_space<smem>>) -> (i32, i32) {
    %c0_i32 = arith.constant 0 : i32
    %c0_i32_0 = arith.constant 0 : i32
    return %arg0, %c0_i32 : i32, i32
  }
  func.func @transform_5(%arg0: i32, %arg1: i32, %arg2: memref<10xi32, #tpu.memory_space<smem>>, %arg3: memref<2xi32, #tpu.memory_space<smem>>, %arg4: memref<5xi32, #tpu.memory_space<smem>>, %arg5: memref<5xi32, #tpu.memory_space<smem>>) -> (i32, i32) {
    %c0_i32 = arith.constant 0 : i32
    %c0_i32_0 = arith.constant 0 : i32
    return %arg0, %c0_i32 : i32, i32
  }
  func.func @transform_6(%arg0: i32, %arg1: i32, %arg2: memref<10xi32, #tpu.memory_space<smem>>, %arg3: memref<2xi32, #tpu.memory_space<smem>>, %arg4: memref<5xi32, #tpu.memory_space<smem>>, %arg5: memref<5xi32, #tpu.memory_space<smem>>) -> (i32, i32) {
    %c0_i32 = arith.constant 0 : i32
    %c0_i32_0 = arith.constant 0 : i32
    return %arg0, %c0_i32 : i32, i32
  }
}

</mosaic_0001>

<bundles_post_ra>
// kernel: tpu_custom_call.1
= control target key start
LH: loop header
LB: loop body
LE: loop exit
PB: predicated region body
PF: predicated region fallthrough
CT: control target
= control target key end

     0   :  { %s1446_s0 = inlined_call_operand.vmem [shape: s32[10], index: 0, kind: input, shape index: {}]   ;;  %s1447_s4 = inlined_call_operand.vmem [shape: bf16[32,32], index: 4, kind: input, shape index: {}]   ;;  %s1448_s5 = inlined_call_operand.vmem [shape: bf16[640,32], index: 5, kind: input, shape index: {}]   ;;  %s1449_s6 = inlined_call_operand.vmem [shape: f32[1,640], index: 6, kind: input, shape index: {}]   ;;  %s1450_s7 = inlined_call_operand.vmem [shape: s32[32,1], index: 7, kind: input, shape index: {}]   ;;  %s1451_s8 = inlined_call_operand.vmem [shape: s32[32,1], index: 8, kind: input, shape index: {}]   ;;  %s1452_s9 = inlined_call_operand.vmem [shape: s32[32,1], index: 9, kind: input, shape index: {}]   ;;  %s1453_s10 = inlined_call_operand.vmem [shape: f32[32,1], index: 10, kind: output, shape index: {}]   ;;  %s1454_s1 = inlined_call_operand.vmem [shape: s32[2], index: 1, kind: input, shape index: {}]   ;;  %s1455_s2 = inlined_call_operand.vmem [shape: s32[5], index: 2, kind: input, shape index: {}]   ;;  %s1456_s3 = inlined_call_operand.vmem [shape: s32[5], index: 3, kind: input, shape index: {}]  }
   0x1   :  { %s15_s15 = sshll.u32 %s1446_s0, 4  ;;  %s19_s18 = sshll.u32 %s1454_s1, 4  ;;  %s16_s15 = int_to_ptr.vmem [resolvable:$true] %s15_s15  ;;  %s20_s18 = int_to_ptr.vmem [resolvable:$true] %s19_s18 }
   0x2   :  { %s1079_s19 = scalar_lea.vmem %s16_s15, 16  ;;  %p1084_p1 = scmp.lt.s32.totalorder %s16_s15, %s16_s15 }
   0x3   :  { %p1080_p0 = scmp.ne.s32.totalorder %s16_s15, %s1079_s19  ;;  %p1085_p2 = scmp.lt.s32.totalorder %s1079_s19, %s1079_s19 }
   0x5   :  { %p1086_p3 = por %p1085_p2, %p1084_p1 }
   0x7   :  { %p1087_p4 = pnand %p1086_p3, %p1080_p0 }
   0x9   :  { %1090 = shalt.err (!%p1087_p4)  }
   0xa   :  { %s1169_s20 = smov [#allocation9]   ;;  %s1091_s21 = scalar_lea.vmem %s20_s18, 16 }
   0xb   :  { %18 = dma.vmem_to_smem %s16_s15, 16, %s1169_s20, [#allocation8] }
   0xc   :  { %p1092_p5 = scmp.ne.s32.totalorder %s20_s18, %s1091_s21  ;;  %p1096_p6 = scmp.lt.s32.totalorder %s20_s18, %s20_s18 }
   0xd   :  { %p1097_p7 = scmp.lt.s32.totalorder %s1091_s21, %s1091_s21 }
   0xf   :  { %p1098_p8 = por %p1097_p7, %p1096_p6 }
  0x11   :  { %p1099_p9 = pnand %p1098_p8, %p1092_p5 }
  0x13   :  { %1102 = shalt.err (!%p1099_p9)  }
  0x14   :  { %s1170_s0 = smov [#allocation10]   ;;  %s23_s23 = sshll.u32 %s1455_s2, 4  ;;  %s24_s23 = int_to_ptr.vmem [resolvable:$true] %s23_s23 }
  0x15   :  { %22 = dma.vmem_to_smem %s20_s18, 16, %s1170_s0, [#allocation8] }
  0x16   :  { %s27_s26 = sshll.u32 %s1456_s3, 4  ;;  %s1103_s27 = scalar_lea.vmem %s24_s23, 16  ;;  %s28_s26 = int_to_ptr.vmem [resolvable:$true] %s27_s26 }
  0x17   :  { %p1104_p10 = scmp.ne.s32.totalorder %s24_s23, %s1103_s27  ;;  %p1108_p11 = scmp.lt.s32.totalorder %s24_s23, %s24_s23 }
  0x18   :  { %p1109_p12 = scmp.lt.s32.totalorder %s1103_s27, %s1103_s27 }
  0x1a   :  { %p1110_p13 = por %p1109_p12, %p1108_p11 }
  0x1c   :  { %p1111_p0 = pnand %p1110_p13, %p1104_p10 }
  0x1e   :  { %1114 = shalt.err (!%p1111_p0)  }
  0x1f   :  { %s1171_s28 = smov [#allocation11]   ;;  %s1115_s29 = scalar_lea.vmem %s28_s26, 16 }
  0x20   :  { %26 = dma.vmem_to_smem %s24_s23, 16, %s1171_s28, [#allocation8] }
  0x21   :  { %p1116_p1 = scmp.ne.s32.totalorder %s28_s26, %s1115_s29  ;;  %p1120_p2 = scmp.lt.s32.totalorder %s28_s26, %s28_s26 }
  0x22   :  { %p1121_p3 = scmp.lt.s32.totalorder %s1115_s29, %s1115_s29 }
  0x24   :  { %p1122_p4 = por %p1121_p3, %p1120_p2 }
  0x26   :  { %p1123_p5 = pnand %p1122_p4, %p1116_p1 }
  0x28   :  { %1126 = shalt.err (!%p1123_p5)  }
  0x29   :  { %s1172_s2 = smov [#allocation12]  }
  0x2a   :  { %30 = dma.vmem_to_smem %s28_s26, 16, %s1172_s2, [#allocation8] }
  0x2b   :  { %1147 = dma.done.wait [#allocation8], 64 }
  0x2c   :  { %1148 = vsyncadd [#allocation8], 4294967232 }
  0x2d   :  { %32 = sfence }
  0x2e   :  { %s1247_s3 = smov 0   ;;  %s1249_s30 = smov 0  }
  0x2f   :  { %s1251_s11 = smov 0   ;;  %s1253_s12 = smov 0  }
  0x30   :  { %s1255_s13 = smov 0  }
  0x31 LB: > { %s47_s14 = sadd.s32 1, %s1159_s11  ;;  %s50_s15 = sadd.s32 1, %s1163_s12  ;;  %s1167_s13 = sphi %s1255_s13, %s38_s13   ;;  %s1163_s12 = sphi %s1253_s12, %s1468_s12   ;;  %s1159_s11 = sphi %s1251_s11, %s1467_s11   ;;  %s1155_s30 = sphi %s1249_s30, %s1466_s30   ;;  %s1151_s3 = sphi %s1247_s3, %s1465_s3  }
  0x32   : > { %p48_p6 = scmp.ge.s32.totalorder %s47_s14, 5  ;;  %p931_p7 = scmp.ge.s32.totalorder %s1167_s13, 1 }
  0x33   : > { %p323_p8 = scmp.lt.s32.totalorder %s1167_s13, 11 }
  0x34   : > { %s1470_s14 = smov (%p48_p6, %s47_s14), 0  ;;  %s1472_s15 = smov (!%p48_p6, %s50_s15), %s1163_s12 }
  0x35   : > { %1457 = sst [smem:[#allocation14_spill]] %s1470_s14  ;;  %p324_p9 = pnand %p931_p7, %p323_p8 }
  0x36   : > { %p52_p10 = scmp.ge.s32.totalorder %s1472_s15, 2  ;;  %s932_s16 = sshll.u32 (!%p324_p9), %s1155_s30, 1 }
  0x37   : > { %327 = sbr.rel (%p324_p9) target bundleno = 1129 (0x469), region = 44  ;;  %p383_p11 = scmp.lt.s32.totalorder (!%p324_p9), %s932_s16, 3 }
  0x38   : > { %s1474_s15 = smov (%p52_p10, %s1472_s15), 0  ;;  %s388_s17 = smul.u32 (!%p324_p9), 5, %s1155_s30 }
  0x39   : > { %1458 = sst [smem:[#allocation15_spill]] %s1474_s15  ;;  %p944_p0 = scmp.ne.s32.totalorder (!%p324_p9), %s1151_s3, 0 }
  0x3a   : > { %s1284_s18 = sadd.s32 (!%p324_p9), %s1151_s3, %s388_s17 }
  0x3b   : > { %s390_s19 = sld [smem:[#allocation9 + %s1284_s18]] (!%p324_p9) }
  0x3c   : > { %s402_s20 = sld [smem:[#allocation9 + %s1284_s18]] (!%p324_p9) }
  0x3e   : > { %s1476_s16 = smov (!%p383_p11, %s932_s16), 3  ;;  %vm438_vm0 = vcmask (!%p944_p0), 7168   ;;  %v1173_v0 = vmov (!%p944_p0), -1e+30   ;;  %v1174_v1 = vmov (!%p944_p0), 0.0   ;;  %v1175_v2 = vmov (!%p944_p0), 1.0  }
  0x3f   : > { %s933_s21 = sshll.u32 %s1476_s16, 2  ;;  %s937_s0 = sshll.u32 %s1476_s16, 3  ;;  %439 = vst.msk [vmem:[#allocation2] sm:$0xff] (!%p944_p0), %vm438_vm0, %v1173_v0  ;;  %440 = vst.msk [vmem:[#allocation2 + $0x8] sm:$0xff] (!%p944_p0), %vm438_vm0, %v1173_v0 }
  0x40   : > { %s1291_s23 = scalar_lea.vmem %s1447_s4, %s933_s21  ;;  %s1296_s26 = scalar_lea.vmem %s1450_s7, %s937_s0  ;;  %445 = vst.msk [vmem:[#allocation5] sm:$0xff] (!%p944_p0), %vm438_vm0, %v1173_v0  ;;  %446 = vst.msk [vmem:[#allocation5 + $0x8] sm:$0xff] (!%p944_p0), %vm438_vm0, %v1173_v0 }
  0x41   : > { %s1301_s29 = scalar_lea.vmem %s1451_s8, %s937_s0  ;;  %s1306_s15 = scalar_lea.vmem %s1452_s9, %s937_s0  ;;  %441 = vst.msk [vmem:[#allocation3] sm:$0xff] (!%p944_p0), %vm438_vm0, %v1174_v1  ;;  %442 = vst.msk [vmem:[#allocation3 + $0x8] sm:$0xff] (!%p944_p0), %vm438_vm0, %v1174_v1 }
  0x42   : > { %s1311_s21 = scalar_lea.vmem %s1453_s10, %s937_s0  ;;  %s934_s1 = sshll.u32 %s390_s19, 4  ;;  %443 = vst.msk [vmem:[#allocation4] sm:$0xff] (!%p944_p0), %vm438_vm0, %v1174_v1  ;;  %444 = vst.msk [vmem:[#allocation4 + $0x8] sm:$0xff] (!%p944_p0), %vm438_vm0, %v1174_v1 }
  0x43   : > { %p403_p12 = scmp.lt.s32.totalorder %s402_s20, 4  ;;  %p392_p13 = scmp.lt.s32.totalorder %s934_s1, 79  ;;  %449 = vst.msk [vmem:[#allocation7] sm:$0xff] (!%p944_p0), %vm438_vm0, %v1174_v1  ;;  %450 = vst.msk [vmem:[#allocation7 + $0x8] sm:$0xff] (!%p944_p0), %vm438_vm0, %v1174_v1 }
  0x44   : > { %437 = sbr.rel (%p944_p0) target bundleno = 75 (0x4b), region = 48  ;;  %447 = vst.msk [vmem:[#allocation6] sm:$0xff] (!%p944_p0), %vm438_vm0, %v1175_v2  ;;  %448 = vst.msk [vmem:[#allocation6 + $0x8] sm:$0xff] (!%p944_p0), %vm438_vm0, %v1175_v2 }
  0x45   : > { %s1478_s20 = smov (!%p403_p12, %s402_s20), 4  ;;  %s1480_s1 = smov (!%p392_p13, %s934_s1), 79 }
  0x46   : > { %s405_s25 = scalar_lea.vmem %s1449_s6, %s1478_s20  ;;  %s935_s27 = sshll.u32 %s1480_s1, 2 }
  0x47   : > { %s1322_s17 = scalar_lea.vmem %s1448_s5, %s935_s27 }
  0x4b PF: > { %s453_s14 = sld [smem:[#allocation9 + %s1284_s18]] }
  0x4c   : > { %s456_s19 = sld [smem:[#allocation10 + %s1155_s30]] }
  0x51   : > { %s1327_s0 = sld [smem:[#allocation11 + %s453_s14]] }
  0x52   : > { %s1329_s16 = sld [smem:[#allocation12 + %s453_s14]]  ;;  %p945_p1 = scmp.ge.s32.totalorder %s1151_s3, %s456_s19 }
  0x53   : > { %v1042_v3 = vld [vmem:[%s1322_s17] sm:$0xff] (!%p945_p1)   ;;  %v1176_v4 = vmov (!%p945_p1), 0.0   ;;  %vm531_vm1 = vcmask (!%p945_p1), 261120   ;;  %v1043_v6 = vld [vmem:[%s1322_s17 + $0x8] sm:$0xff] (!%p945_p1)   ;;  %vm1177_vm2 = vmmov (!%p945_p1), 0   ;;  %v1044_v8 = vld [vmem:[%s1322_s17 + $0x10] sm:$0xff] (!%p945_p1)   ;;  %v600_v28 = vlaneseq (!%p945_p1) }
  0x54   : > { %460 = sbr.rel (%p945_p1) target bundleno = 1103 (0x44f), region = 52  ;;  %971 = vmatprep.subr.bf16.mxu0 (!%p945_p1), %v1176_v4  ;;  %v536_v5 = vsel (!%p945_p1), %vm531_vm1, %v1042_v3, 0  ;;  %v539_v7 = vsel (!%p945_p1), %vm531_vm1, %v1043_v6, 0  ;;  %987 = vmatprep.mubr.msk.bf16.mxu0 (!%p945_p1), %vm1177_vm2, %v1176_v4  ;;  %v542_v9 = vsel (!%p945_p1), %vm531_vm1, %v1044_v8, 0  ;;  %v1045_v10 = vld [vmem:[%s1322_s17 + $0x18] sm:$0xff] (!%p945_p1)   ;;  %v1046_v12 = vld [vmem:[%s1322_s17 + $0x20] sm:$0xff] (!%p945_p1)  }
  0x55   : > { %972 = vmatpush3.bf16.xpose.msra.mxu0 (!%p945_p1), %v536_v5  ;;  %v545_v11 = vsel (!%p945_p1), %vm531_vm1, %v1045_v10, 0  ;;  %v548_v13 = vsel (!%p945_p1), %vm531_vm1, %v1046_v12, 0  ;;  %v1047_v14 = vld [vmem:[%s1322_s17 + $0x28] sm:$0xff] (!%p945_p1)   ;;  %v1048_v16 = vld [vmem:[%s1322_s17 + $0x30] sm:$0xff] (!%p945_p1)   ;;  %v1049_v18 = vld [vmem:[%s1322_s17 + $0x38] sm:$0xff] (!%p945_p1)   ;;  %v1361_v29 = vand.u32 (!%p945_p1), 127, %v600_v28 }
  0x56   : > { %973 = vmatprep.subr.bf16.mxu0 (!%p945_p1), %v1176_v4  ;;  %v551_v15 = vsel (!%p945_p1), %vm531_vm1, %v1047_v14, 0  ;;  %v554_v17 = vsel (!%p945_p1), %vm531_vm1, %v1048_v16, 0  ;;  %v557_v19 = vsel (!%p945_p1), %vm531_vm1, %v1049_v18, 0  ;;  %v1050_v20 = vld [vmem:[%s1291_s23] sm:$0xff] (!%p945_p1)  }
  0x57   : > { %v946_v21 = vld [vmem:[%s405_s25] ss:$0 sm:$0xff] (!%p945_p1)  ;;  %p957_p2 = scmp.ne.s32.totalorder (!%p945_p1), %s1327_s0, 0 }
  0x5b   : > { %v610_v32 = vld [vmem:[#allocation2] sm:$0xff] (!%p957_p2)  ;;  %v611_v33 = vld [vmem:[#allocation2 + $0x8] sm:$0xff] (!%p957_p2)  ;;  %v655_v35 = vstv (!%p957_p2), %s1329_s16  ;;  %v1178_v36 = vmov (!%p957_p2), 0   ;;  %vm646_vm3 = vcmask (!%p957_p2), 7168   ;;  %v614_v59 = vld [vmem:[#allocation3] sm:$0xff] (!%p957_p2) }
  0x5c   : > { %v653_v34 = vld [vmem:[%s1301_s29] sm:$0xff] (!%p957_p2)  ;;  %1051 = vset.pattern.permute.xlu0 (!%p957_p2), %v1178_v36  ;;  %1052 = vset.pattern.permute.xlu1 (!%p957_p2), %v1178_v36  ;;  %v654_v39 = vld [vmem:[%s1301_s29 + $0x8] sm:$0xff] (!%p957_p2)  ;;  %v615_v62 = vld [vmem:[#allocation3 + $0x8] sm:$0xff] (!%p957_p2) }
  0x5d   : > { %974 = vmatpush3.bf16.xpose.msra.mxu0 %v539_v7  ;;  %v656_v40 = vsub.s32 (!%p957_p2), %v653_v34, %v655_v35  ;;  %v657_v43 = vsub.s32 (!%p957_p2), %v654_v39, %v655_v35  ;;  %v651_v2 = vld [vmem:[#allocation4] sm:$0xff] (!%p957_p2)  ;;  %v652_v7 = vld [vmem:[#allocation4 + $0x8] sm:$0xff] (!%p957_p2) }
  0x5e   : > { %975 = vmatprep.subr.bf16.mxu0 %v1176_v4 }
  0x5f   : > { %659 = vperm.xlu1 (!%p957_p2), %1052, %v656_v40  }
  0x63   : > { %662 = vperm.xlu1 (!%p957_p2), %1052, %v657_v43  }
  0x65   : > { %976 = vmatpush3.bf16.xpose.msra.mxu0 %v542_v9 }
  0x66   : > { %977 = vmatprep.subr.bf16.mxu0 %v1176_v4 }
  0x6d   : > { %978 = vmatpush3.bf16.xpose.msra.mxu0 %v545_v11 }
  0x6e   : > { %979 = vmatprep.subr.bf16.mxu0 %v1176_v4 }
  0x75   : > { %980 = vmatpush3.bf16.xpose.msra.mxu0 %v548_v13 }
  0x76   : > { %981 = vmatprep.subr.bf16.mxu0 %v1176_v4 }
  0x7d   : > { %982 = vmatpush3.bf16.xpose.msra.mxu0 %v551_v15 }
  0x7e   : > { %983 = vmatprep.subr.bf16.mxu0 %v1176_v4 }
  0x85   : > { %984 = vmatpush3.bf16.xpose.msra.mxu0 %v554_v17 }
  0x86   : > { %985 = vmatprep.subr.bf16.mxu0 %v1176_v4 }
  0x8d   : > { %986 = vmatpush3.bf16.xpose.msra.mxu0 %v557_v19 }
  0x94   : > { %988 = vmatmul.mubr.msk.bf16.vlgmr.msra.gmra.mrb[0].mxu0 %vm531_vm1, %v1050_v20 }
  0xde   : > { %v660_v50 = vpop.permute.xlu1 (!%p957_p2), %659 }
  0xdf   : > { %vm664_vm4 = vcmp.eq.s32.totalorder (!%p957_p2), %v1361_v29, %v660_v50 }
  0xe2   : > { %v663_v52 = vpop.permute.xlu1 (!%p957_p2), %662 }
  0xe3   : > { %vm665_vm5 = vcmp.eq.s32.totalorder (!%p957_p2), %v1361_v29, %v663_v52 }
 0x167   : > { %v593_v22 = vpop.f32.mrb[0].mxu0 }
 0x168   : > { %v989_v23 = vpop.f32.mrb[1].mxu0  ;;  %v1355_v24 = vadd.f32 %v946_v21, %v593_v22 }
 0x169   : > { %v596_v25 = vpop.f32.mrb[2].mxu0 }
 0x16a   : > { %602 = vmax.xlane.f32.xlu0 %v1355_v24  ;;  %v990_v26 = vpop.f32.mrb[3].mxu0  ;;  %v1358_v27 = vadd.f32 %v946_v21, %v596_v25  ;;  %v666_v53 = vsel (!%p957_p2), %vm664_vm4, %v1355_v24, 0.0 }
 0x16c   : > { %v667_v55 = vsel (!%p957_p2), %vm665_vm5, %v1358_v27, 0.0 }
 0x16e   : > { %604 = vmax.xlane.f32.xlu0 %v1358_v27 }
 0x1f5   : > { %609 = sbr.rel (%p957_p2) target bundleno = 802 (0x322), region = 56 }
 0x1f7   : > { %v1363_v30 = vpop.xlane.xlu0 %602 }
 0x1f8   : > { %v612_v37 = vmax.f32 (!%p957_p2), %v610_v32, %v1363_v30 }
 0x1fa   : > { %626 = vperm.xlu0 (!%p957_p2), %1051, %v612_v37   ;;  %v616_v41 = vsub.f32 (!%p957_p2), %v610_v32, %v612_v37  ;;  %649 = vst.msk [vmem:[#allocation2] sm:$0xff] (!%p957_p2), %vm646_vm3, %v612_v37 }
 0x1fb   : > { %v1365_v31 = vpop.xlane.xlu0 %604 }
 0x1fc   : > { %v613_v38 = vmax.f32 %v611_v33, %v1365_v31  ;;  %v618_v56 = vmul.f32 1.442695, %v616_v41 }
 0x1fe   : > { %v617_v42 = vsub.f32 %v611_v33, %v613_v38  ;;  %650 = vst.msk [vmem:[#allocation2 + $0x8] sm:$0xff] %vm646_vm3, %v613_v38  ;;  %631 = vperm.xlu0 %1051, %v613_v38  }
 0x200   : > { %v620_v57 = vmul.f32 1.442695, %v617_v42 }
 0x279   : > { %v627_v44 = vpop.permute.xlu0 %626 }
 0x27a   : > { %v634_v45 = vsub.f32 %v1355_v24, %v627_v44 }
 0x27c   : > { %v636_v46 = vmul.f32 1.442695, %v634_v45 }
 0x27d   : > { %v632_v47 = vpop.permute.xlu0 %631 }
 0x27e   : > { %1053 = vpow2.f32 %v636_v46  ;;  %v635_v48 = vsub.f32 %v1358_v27, %v632_v47 }
 0x280   : > { %v638_v49 = vmul.f32 1.442695, %v635_v48 }
 0x282   : > { %1055 = vpow2.f32 %v638_v49 }
 0x283   : > { %1057 = vpow2.f32 %v618_v56 }
 0x284   : > { %1059 = vpow2.f32 %v620_v57 }
 0x288   : > { %v1054_v51 = vpop.eup %1053 }
 0x289   : > { %640 = vadd.xlane.f32.xlu0 %v1054_v51 }
 0x28c   : > { %v1056_v54 = vpop.eup %1055 }
 0x28d   : > { %668 = vadd.xlane.f32.xlu0 %v666_v53  ;;  %642 = vadd.xlane.f32.xlu1 %v1056_v54  ;;  %v1058_v58 = vpop.eup %1057 }
 0x28e   : > { %v622_v60 = vmul.f32 %v1058_v58, %v614_v59  ;;  %v1060_v61 = vpop.eup %1059 }
 0x28f   : > { %v623_v1 = vmul.f32 %v1060_v61, %v615_v62 }
 0x291   : > { %670 = vadd.xlane.f32.xlu0 %v667_v55 }
 0x316   : > { %v641_v63 = vpop.xlane.xlu0 %640 }
 0x317   : > { %v644_v0 = vadd.f32 %v641_v63, %v622_v60 }
 0x319   : > { %647 = vst.msk [vmem:[#allocation3] sm:$0xff] %vm646_vm3, %v644_v0 }
 0x31a   : > { %v643_v3 = vpop.xlane.xlu1 %642  ;;  %v669_v4 = vpop.xlane.xlu0 %668 }
 0x31b   : > { %v645_v5 = vadd.f32 %v643_v3, %v623_v1  ;;  %v672_v6 = vadd.f32 %v669_v4, %v651_v2 }
 0x31d   : > { %648 = vst.msk [vmem:[#allocation3 + $0x8] sm:$0xff] %vm646_vm3, %v645_v5  ;;  %674 = vst.msk [vmem:[#allocation4] sm:$0xff] %vm646_vm3, %v672_v6 }
 0x31e   : > { %v671_v8 = vpop.xlane.xlu0 %670 }
 0x31f   : > { %v673_v9 = vadd.f32 %v671_v8, %v652_v7 }
 0x321   : > { %675 = vst.msk [vmem:[#allocation4 + $0x8] sm:$0xff] %vm646_vm3, %v673_v9 }
 0x322 PF: > { %p958_p3 = scmp.le.s32.totalorder %s1327_s0, 0 }
 0x323   : > { %v685_v10 = vld [vmem:[#allocation5] sm:$0xff] (!%p958_p3)  ;;  %v686_v11 = vld [vmem:[#allocation5 + $0x8] sm:$0xff] (!%p958_p3)  ;;  %v732_v12 = vld [vmem:[%s1306_s15] sm:$0xff] (!%p958_p3)  ;;  %v734_v13 = vstv (!%p958_p3), %s1329_s16  ;;  %v1179_v14 = vmov (!%p958_p3), 0   ;;  %v682_v36 = vstv (!%p958_p3), %s1327_s0  ;;  %vm723_vm9 = vcmask (!%p958_p3), 7168  }
 0x324   : > { %679 = sbr.rel (%p958_p3) target bundleno = 1103 (0x44f), region = 60  ;;  %1061 = vset.pattern.permute.xlu0 (!%p958_p3), %v1179_v14  ;;  %v687_v15 = vmax.f32 (!%p958_p3), %v685_v10, %v1363_v30  ;;  %1062 = vset.pattern.permute.xlu1 (!%p958_p3), %v1179_v14  ;;  %v733_v16 = vld [vmem:[%s1306_s15 + $0x8] sm:$0xff] (!%p958_p3)  ;;  %v735_v17 = vsub.s32 (!%p958_p3), %v732_v12, %v734_v13  ;;  %v688_v18 = vmax.f32 (!%p958_p3), %v686_v11, %v1365_v31  ;;  %v680_v35 = vld [vmem:[%s1296_s26] sm:$0xff] (!%p958_p3)  ;;  %v751_v51 = vld [vmem:[#allocation7] sm:$0xff] (!%p958_p3) }
 0x325   : > { %v736_v19 = vsub.s32 (!%p958_p3), %v733_v16, %v734_v13  ;;  %vm1399_vm8 = vcmp.eq.s32.totalorder (!%p958_p3), %v680_v35, %v682_v36  ;;  %v681_v39 = vld [vmem:[%s1296_s26 + $0x8] sm:$0xff] (!%p958_p3)  ;;  %v689_v44 = vld [vmem:[#allocation6] sm:$0xff] (!%p958_p3)  ;;  %v752_v58 = vld [vmem:[#allocation7 + $0x8] sm:$0xff] (!%p958_p3) }
 0x326   : > { %701 = vperm.xlu0 (!%p958_p3), %1061, %v687_v15   ;;  %738 = vperm.xlu1 (!%p958_p3), %1062, %v735_v17   ;;  %v721_v38 = vsel (!%p958_p3), %vm1399_vm8, %v687_v15, %v685_v10  ;;  %vm1407_vm10 = vcmp.eq.s32.totalorder (!%p958_p3), %v681_v39, %v682_v36  ;;  %v692_v41 = vsub.f32 (!%p958_p3), %v686_v11, %v688_v18  ;;  %v690_v47 = vld [vmem:[#allocation6 + $0x8] sm:$0xff] (!%p958_p3) }
 0x327   : > { %724 = vst.msk [vmem:[#allocation5] sm:$0xff] (!%p958_p3), %vm723_vm9, %v721_v38 }
 0x328   : > { %v695_v42 = vmul.f32 (!%p958_p3), 1.442695, %v692_v41 }
 0x32a   : > { %706 = vperm.xlu0 (!%p958_p3), %1061, %v688_v18   ;;  %741 = vperm.xlu1 (!%p958_p3), %1062, %v736_v19  }
 0x3a5   : > { %v702_v20 = vpop.permute.xlu0 %701  ;;  %v739_v28 = vpop.permute.xlu1 %738 }
 0x3a6   : > { %v709_v21 = vsub.f32 %v1355_v24, %v702_v20  ;;  %vm743_vm6 = vcmp.eq.s32.totalorder %v1361_v29, %v739_v28 }
 0x3a7   : > { %v745_v32 = vsel %vm743_vm6, %v1355_v24, 0.0 }
 0x3a8   : > { %v711_v22 = vmul.f32 1.442695, %v709_v21 }
 0x3a9   : > { %v707_v23 = vpop.permute.xlu0 %706  ;;  %v742_v31 = vpop.permute.xlu1 %741 }
 0x3aa   : > { %1063 = vpow2.f32 %v711_v22  ;;  %v710_v25 = vsub.f32 %v1358_v27, %v707_v23  ;;  %vm744_vm7 = vcmp.eq.s32.totalorder %v1361_v29, %v742_v31  ;;  %v691_v29 = vsub.f32 %v685_v10, %v687_v15 }
 0x3ab   : > { %v746_v34 = vsel %vm744_vm7, %v1358_v27, 0.0  ;;  %v722_v27 = vsel %vm1407_vm10, %v688_v18, %v686_v11 }
 0x3ac   : > { %v713_v26 = vmul.f32 1.442695, %v710_v25  ;;  %725 = vst.msk [vmem:[#allocation5 + $0x8] sm:$0xff] %vm723_vm9, %v722_v27  ;;  %v693_v40 = vmul.f32 1.442695, %v691_v29 }
 0x3ae   : > { %1065 = vpow2.f32 %v713_v26 }
 0x3af   : > { %1067 = vpow2.f32 %v693_v40 }
 0x3b0   : > { %1069 = vpow2.f32 %v695_v42 }
 0x3b4   : > { %v1064_v30 = vpop.eup %1063 }
 0x3b5   : > { %715 = vadd.xlane.f32.xlu0 %v1064_v30 }
 0x3b8   : > { %v1066_v33 = vpop.eup %1065 }
 0x3b9   : > { %747 = vadd.xlane.f32.xlu0 %v745_v32  ;;  %717 = vadd.xlane.f32.xlu1 %v1066_v33  ;;  %v1068_v43 = vpop.eup %1067 }
 0x3ba   : > { %v697_v45 = vmul.f32 %v1068_v43, %v689_v44  ;;  %v1070_v46 = vpop.eup %1069 }
 0x3bb   : > { %v698_v50 = vmul.f32 %v1070_v46, %v690_v47 }
 0x3bd   : > { %749 = vadd.xlane.f32.xlu0 %v746_v34 }
 0x442   : > { %v716_v48 = vpop.xlane.xlu0 %715 }
 0x443   : > { %v719_v49 = vadd.f32 %v716_v48, %v697_v45 }
 0x445   : > { %v728_v52 = vsel %vm1399_vm8, %v719_v49, %v689_v44 }
 0x446   : > { %v718_v53 = vpop.xlane.xlu1 %717  ;;  %v748_v54 = vpop.xlane.xlu0 %747  ;;  %730 = vst.msk [vmem:[#allocation6] sm:$0xff] %vm723_vm9, %v728_v52 }
 0x447   : > { %v720_v55 = vadd.f32 %v718_v53, %v698_v50  ;;  %v753_v56 = vsel %vm1399_vm8, %v748_v54, 0.0 }
 0x448   : > { %v755_v57 = vadd.f32 %v753_v56, %v751_v51 }
 0x449   : > { %v729_v59 = vsel %vm1407_vm10, %v720_v55, %v690_v47 }
 0x44a   : > { %757 = vst.msk [vmem:[#allocation7] sm:$0xff] %vm723_vm9, %v755_v57  ;;  %v750_v60 = vpop.xlane.xlu0 %749  ;;  %731 = vst.msk [vmem:[#allocation6 + $0x8] sm:$0xff] %vm723_vm9, %v729_v59 }
 0x44b   : > { %v754_v61 = vsel %vm1407_vm10, %v750_v60, 0.0 }
 0x44c   : > { %v756_v62 = vadd.f32 %v754_v61, %v752_v58 }
 0x44e   : > { %758 = vst.msk [vmem:[#allocation7 + $0x8] sm:$0xff] %vm723_vm9, %v756_v62 }
 0x44f PF: > { %p959_p4 = scmp.ne.s32.totalorder %s1151_s3, 4 }
 0x450   : > { %v765_v63 = vld [vmem:[#allocation3] sm:$0xff] (!%p959_p4)  ;;  %v779_v0 = vld [vmem:[#allocation6] sm:$0xff] (!%p959_p4)  ;;  %v766_v1 = vld [vmem:[#allocation3 + $0x8] sm:$0xff] (!%p959_p4)  ;;  %vm799_vm13 = vcmask (!%p959_p4), 7168  }
 0x451   : > { %762 = sbr.rel (%p959_p4) target bundleno = 1129 (0x469), region = 64  ;;  %1071 = vlog2.f32 (!%p959_p4), %v765_v63  ;;  %v780_v2 = vld [vmem:[#allocation6 + $0x8] sm:$0xff] (!%p959_p4)  ;;  %v763_v4 = vld [vmem:[#allocation2] sm:$0xff] (!%p959_p4)  ;;  %v791_v15 = vld [vmem:[#allocation7] sm:$0xff] (!%p959_p4) }
 0x452   : > { %1073 = vlog2.f32 (!%p959_p4), %v779_v0  ;;  %v777_v7 = vld [vmem:[#allocation5] sm:$0xff] (!%p959_p4)  ;;  %v773_v9 = vld [vmem:[#allocation4] sm:$0xff] (!%p959_p4)  ;;  %v764_v12 = vld [vmem:[#allocation2 + $0x8] sm:$0xff] (!%p959_p4) }
 0x453   : > { %1075 = vlog2.f32 (!%p959_p4), %v766_v1  ;;  %v787_v11 = vld [vmem:[%s1296_s26] sm:$0xff] (!%p959_p4)  ;;  %v778_v17 = vld [vmem:[#allocation5 + $0x8] sm:$0xff] (!%p959_p4)  ;;  %v774_v19 = vld [vmem:[#allocation4 + $0x8] sm:$0xff] (!%p959_p4) }
 0x454   : > { %1077 = vlog2.f32 (!%p959_p4), %v780_v2  ;;  %v788_v21 = vld [vmem:[%s1296_s26 + $0x8] sm:$0xff] (!%p959_p4)  ;;  %vm789_vm11 = vcmp.gt.s32.totalorder (!%p959_p4), %v787_v11, 0 }
 0x455   : > { %v792_v25 = vld [vmem:[#allocation7 + $0x8] sm:$0xff] (!%p959_p4)  ;;  %vm790_vm12 = vcmp.gt.s32.totalorder (!%p959_p4), %v788_v21, 0 }
 0x45b   : > { %v1072_v3 = vpop.eup %1071 }
 0x45c   : > { %v1074_v5 = vpop.eup %1073  ;;  %v768_v6 = vmul.f32 0.6931472, %v1072_v3 }
 0x45d   : > { %v1076_v8 = vpop.eup %1075  ;;  %v782_v10 = vmul.f32 0.6931472, %v1074_v5 }
 0x45e   : > { %v1078_v13 = vpop.eup %1077  ;;  %v771_v14 = vadd.f32 %v768_v6, %v763_v4  ;;  %v770_v16 = vmul.f32 0.6931472, %v1076_v8 }
 0x45f   : > { %v785_v18 = vadd.f32 %v782_v10, %v777_v7  ;;  %v784_v20 = vmul.f32 0.6931472, %v1078_v13 }
 0x460   : > { %v775_v22 = vsub.f32 %v771_v14, %v773_v9  ;;  %v772_v23 = vadd.f32 %v770_v16, %v764_v12 }
 0x461   : > { %v793_v26 = vsub.f32 %v785_v18, %v791_v15  ;;  %v786_v28 = vadd.f32 %v784_v20, %v778_v17 }
 0x462   : > { %v776_v30 = vsub.f32 %v772_v23, %v774_v19 }
 0x463   : > { %v795_v31 = vsel %vm789_vm11, %v793_v26, 0.0  ;;  %v794_v32 = vsub.f32 %v786_v28, %v792_v25 }
 0x464   : > { %v797_v33 = vadd.f32 %v795_v31, %v775_v22 }
 0x465   : > { %v796_v34 = vsel %vm790_vm12, %v794_v32, 0.0 }
 0x466   : > { %800 = vst.msk [vmem:[%s1311_s21] sm:$0xff] %vm799_vm13, %v797_v33  ;;  %v798_v35 = vadd.f32 %v796_v34, %v776_v30 }
 0x468   : > { %801 = vst.msk [vmem:[%s1311_s21 + $0x8] sm:$0xff] %vm799_vm13, %v798_v35 }
 0x469 PF: > { %s38_s13 = sadd.s32 1, %s1167_s13   ;;  %s1463_s15 = sld [smem:[#allocation14_spill]] }
 0x46a   : > { %p35_p5 = scmp.ge.s32.totalorder %s38_s13, 12   ;;  %s1464_s20 = sld [smem:[#allocation15_spill]] }
 0x46b   : > { %s1465_s3 = smov %s1159_s11  ;;  %s1466_s30 = smov %s1163_s12 }
 0x46c   :  { %37 = sbr.rel (!%p35_p5) target bundleno = 49 (0x31), region = 109 }
 0x46f   : > { %s1467_s11 = smov %s1463_s15 }
 0x470   : > { %s1468_s12 = smov %s1464_s20 }

</bundles_post_ra>
